<compile_context>
chip_gen: v5e
topology: v5e:2x2
jax: 0.10.0
libtpu: 0.0.40
codegen_flags: <defaults>
</compile_context>

<pallas_src>
import jax
import jax.numpy as jnp
from jax.experimental import pallas as pl
from jax.experimental.pallas import tpu as pltpu

STATE_DIM = 2
HIDDEN_DIM = 32
FUSED_HIDDEN = 2 * HIDDEN_DIM        # [obs-branch | trans-branch]
OUT_DIM = 1 + STATE_DIM              # row 0: obs logit, rows 1..2: trans pred
LANE = 128                           # lane width (last dim must be mult. of 128)
TILE_B = 8192                        # batch lanes per grid step


def _fused_mlp_kernel(x_ref, w1_ref, w2_ref, w3_ref, b_ref, out_ref):
    x = x_ref[...]                    # (2, tb)  batch on lanes
    w1 = w1_ref[...]                  # (64, 2)
    b = b_ref[...]                    # (64, 3)  col0=b1, col1=b2, col2[:3]=b3

    # Layer 1 (K=2) on the VPU: two broadcast multiply-adds. A K=2 MXU pass
    # would use <1% of the systolic array -> pure push overhead.
    h = w1[:, 0:1] * x[0:1, :] + w1[:, 1:2] * x[1:2, :] + b[:, 0:1]   # (64, tb)
    h = jnp.maximum(h, 0.0)

    # Layers 2 and 3 on the MXU (DEFAULT precision: bf16 multiply, f32 acc).
    h = jnp.dot(w2_ref[...], h, preferred_element_type=jnp.float32) + b[:, 1:2]
    h = jnp.maximum(h, 0.0)                                           # (64, tb)
    y = (jnp.dot(w3_ref[...], h, preferred_element_type=jnp.float32)
         + b[:OUT_DIM, 2:3])                                          # (3, tb)

    # Sigmoid only on the obs row. Padded batch lanes carry bias-only garbage
    # that is sliced off in the wrapper. Both stores are lane-dense.
    out_ref[0:1, :] = jax.nn.sigmoid(y[0:1, :])
    out_ref[1:OUT_DIM, :] = y[1:OUT_DIM, :]


def _round_up(x, m):
    return ((x + m - 1) // m) * m


@jax.jit
def tiny_generative_model(state, packed):
    """state: (B, STATE_DIM) f32; packed: output of pack_params().

    Returns (obs_prob (B, 1), trans_pred (B, STATE_DIM))."""
    B = state.shape[0]
    B128 = _round_up(max(B, 1), LANE)
    # >=2 grid steps whenever the 128-aligned batch allows it (v7x megacore),
    # while keeping padding waste small for large batches.
    n_tiles = max(2, -(-B128 // TILE_B))
    tb = min(TILE_B, _round_up(-(-B128 // n_tiles), LANE))
    Bp = _round_up(B128, tb)

    # Batch-in-lanes layout: (STATE_DIM, Bp). Wrapper transpose is ~40 B/row of
    # HBM traffic -- negligible vs. the MXU-push-bound kernel.
    x = jnp.pad(state, ((0, Bp - B), (0, 0))).T
    grid = (Bp // tb,)

    fused = pl.pallas_call(
        _fused_mlp_kernel,
        out_shape=jax.ShapeDtypeStruct((OUT_DIM, Bp), jnp.float32),
        grid=grid,
        in_specs=[
            pl.BlockSpec((STATE_DIM, tb), lambda i: (0, i)),               # x
            pl.BlockSpec((FUSED_HIDDEN, STATE_DIM), lambda i: (0, 0)),     # w1
            pl.BlockSpec((FUSED_HIDDEN, FUSED_HIDDEN), lambda i: (0, 0)),  # w2
            pl.BlockSpec((OUT_DIM, FUSED_HIDDEN), lambda i: (0, 0)),       # w3
            pl.BlockSpec((FUSED_HIDDEN, 3), lambda i: (0, 0)),             # biases
        ],
        out_specs=pl.BlockSpec((OUT_DIM, tb), lambda i: (0, i)),
        compiler_params=pltpu.CompilerParams(
            dimension_semantics=("parallel",),
            # Worst-case per-step footprint (tb=8192, incl. double buffering
            # and f32 intermediates) is ~5-8 MiB; 16 MiB leaves headroom.
            vmem_limit_bytes=16 * 1024 * 1024,
        ),
    )(x, packed["w1"], packed["w2"], packed["w3"], packed["biases"])

    obs_prob = fused[0:1, :B].T                 # (B, 1)
    trans_pred = fused[1:OUT_DIM, :B].T         # (B, STATE_DIM)
    return obs_prob, trans_pred


def init_params(key, state_dim=STATE_DIM, hidden_dim=HIDDEN_DIM):
    """torch.nn.Linear-style init: W (out, in), b (out,), uniform(+-1/sqrt(fan_in))."""
    def linear(k, fan_in, fan_out):
        kw, kb = jax.random.split(k)
        bound = float(fan_in) ** -0.5
        w = jax.random.uniform(kw, (fan_out, fan_in), jnp.float32, -bound, bound)
        b = jax.random.uniform(kb, (fan_out,), jnp.float32, -bound, bound)
        return w, b

    keys = jax.random.split(key, 6)
    ow1, ob1 = linear(keys[0], state_dim, hidden_dim)
    ow2, ob2 = linear(keys[1], hidden_dim, hidden_dim)
    ow3, ob3 = linear(keys[2], hidden_dim, 1)
    tw1, tb1 = linear(keys[3], state_dim, hidden_dim)
    tw2, tb2 = linear(keys[4], hidden_dim, hidden_dim)
    tw3, tb3 = linear(keys[5], hidden_dim, state_dim)
    return dict(ow1=ow1, ob1=ob1, ow2=ow2, ob2=ob2, ow3=ow3, ob3=ob3,
                tw1=tw1, tb1=tb1, tw2=tw2, tb2=tb2, tw3=tw3, tb3=tb3)


def pack_params(p):
    """Pack the two 3-layer MLPs into one fused, block-structured (out,in) chain."""
    H = HIDDEN_DIM
    w1 = jnp.concatenate([p["ow1"], p["tw1"]], axis=0)                    # (64, 2)
    w2 = jnp.zeros((2 * H, 2 * H), jnp.float32)
    w2 = w2.at[:H, :H].set(p["ow2"]).at[H:, H:].set(p["tw2"])             # blockdiag
    w3 = jnp.zeros((OUT_DIM, 2 * H), jnp.float32)
    w3 = w3.at[0:1, :H].set(p["ow3"]).at[1:OUT_DIM, H:].set(p["tw3"])     # (3, 64)
    biases = jnp.zeros((2 * H, 3), jnp.float32)
    biases = biases.at[:, 0].set(jnp.concatenate([p["ob1"], p["tb1"]]))
    biases = biases.at[:, 1].set(jnp.concatenate([p["ob2"], p["tb2"]]))
    biases = biases.at[:OUT_DIM, 2].set(jnp.concatenate([p["ob3"], p["tb3"]]))
    return dict(w1=w1, w2=w2, w3=w3, biases=biases)


def _reference(state, p):
    """Torch-faithful f32 reference (HIGHEST precision => exact f32 matmuls)."""
    hp = jax.lax.Precision.HIGHEST

    def mlp(x, w1, b1, w2, b2, w3, b3):
        h = jnp.maximum(jnp.dot(x, w1.T, precision=hp) + b1, 0.0)
        h = jnp.maximum(jnp.dot(h, w2.T, precision=hp) + b2, 0.0)
        return jnp.dot(h, w3.T, precision=hp) + b3

    obs = jax.nn.sigmoid(
        mlp(state, p["ow1"], p["ob1"], p["ow2"], p["ob2"], p["ow3"], p["ob3"]))
    trans = mlp(state, p["tw1"], p["tb1"], p["tw2"], p["tb2"], p["tw3"], p["tb3"])
    return obs, trans


if __name__ == "__main__":
    key = jax.random.PRNGKey(0)
    k_param, k_state1, k_state2 = jax.random.split(key, 3)

    params = init_params(k_param)
    packed = pack_params(params)

    # Small shapes consistent with the module: (batch, state_dim=2).
    batch = 8
    state = jax.random.normal(k_state1, (batch, STATE_DIM), jnp.float32)
    obs_prob, trans_pred = tiny_generative_model(state, packed)
    jax.block_until_ready((obs_prob, trans_pred))
    ref_obs, ref_trans = _reference(state, params)
    assert obs_prob.shape == (batch, 1) and trans_pred.shape == (batch, STATE_DIM)
    # Kernel matmuls use DEFAULT MXU precision (bf16 multiply, f32 accumulate);
    # the reference is exact f32, so the tolerance covers bf16-multiply error.
    assert jnp.allclose(obs_prob, ref_obs, atol=1e-2, rtol=1e-2)
    assert jnp.allclose(trans_pred, ref_trans, atol=1e-2, rtol=1e-2)

    # Ragged batch (exercises lane padding + slice-back path).
    batch2 = 13
    state2 = jax.random.normal(k_state2, (batch2, STATE_DIM), jnp.float32)
    obs2, trans2 = tiny_generative_model(state2, packed)
    jax.block_until_ready((obs2, trans2))
    ref_obs2, ref_trans2 = _reference(state2, params)
    assert obs2.shape == (batch2, 1) and trans2.shape == (batch2, STATE_DIM)
    assert jnp.allclose(obs2, ref_obs2, atol=1e-2, rtol=1e-2)
    assert jnp.allclose(trans2, ref_trans2, atol=1e-2, rtol=1e-2)

    print("KERNEL_OK")
</pallas_src>

<mosaic_0001>
module attributes {stable_mosaic.version = 11 : i64} {
  func.func @_fused_mlp_kernel(%arg0: i32, %arg1: memref<2x128xf32, #tpu.memory_space<vmem>>, %arg2: memref<64x2xf32, #tpu.memory_space<vmem>>, %arg3: memref<64x64xf32, #tpu.memory_space<vmem>>, %arg4: memref<3x64xf32, #tpu.memory_space<vmem>>, %arg5: memref<64x3xf32, #tpu.memory_space<vmem>>, %arg6: memref<3x128xf32, #tpu.memory_space<vmem>>) attributes {dimension_semantics = [#tpu.dimension_semantics<parallel>], iteration_bounds = array<i64: 1>, scalar_prefetch = 0 : i64, scratch_operands = 0 : i64, tpu.core_type = #tpu.core_type<tc>, window_params = [{transform_indices = @transform_0, window_bounds = array<i64: 2, 128>}, {pipeline_mode = #tpu.pipeline_mode<synchronous>, transform_indices = @transform_1, window_bounds = array<i64: 64, 2>}, {pipeline_mode = #tpu.pipeline_mode<synchronous>, transform_indices = @transform_2, window_bounds = array<i64: 64, 64>}, {pipeline_mode = #tpu.pipeline_mode<synchronous>, transform_indices = @transform_3, window_bounds = array<i64: 3, 64>}, {pipeline_mode = #tpu.pipeline_mode<synchronous>, transform_indices = @transform_4, window_bounds = array<i64: 64, 3>}, {transform_indices = @transform_5, window_bounds = array<i64: 3, 128>}]} {
    %c0 = arith.constant 0 : index
    %c0_0 = arith.constant 0 : index
    %0 = vector.load %arg1[%c0, %c0_0] : memref<2x128xf32, #tpu.memory_space<vmem>>, vector<2x128xf32>
    %c0_1 = arith.constant 0 : index
    %c0_2 = arith.constant 0 : index
    %1 = vector.load %arg2[%c0_1, %c0_2] : memref<64x2xf32, #tpu.memory_space<vmem>>, vector<64x2xf32>
    %c0_3 = arith.constant 0 : index
    %c0_4 = arith.constant 0 : index
    %2 = vector.load %arg5[%c0_3, %c0_4] : memref<64x3xf32, #tpu.memory_space<vmem>>, vector<64x3xf32>
    %3 = vector.extract_strided_slice %1 {offsets = [0, 0], sizes = [64, 1], strides = [1, 1]} : vector<64x2xf32> to vector<64x1xf32>
    %4 = vector.extract_strided_slice %0 {offsets = [0, 0], sizes = [1, 128], strides = [1, 1]} : vector<2x128xf32> to vector<1x128xf32>
    %5 = vector.broadcast %3 : vector<64x1xf32> to vector<64x128xf32>
    %6 = vector.broadcast %4 : vector<1x128xf32> to vector<64x128xf32>
    %7 = arith.mulf %5, %6 : vector<64x128xf32>
    %8 = vector.extract_strided_slice %1 {offsets = [0, 1], sizes = [64, 1], strides = [1, 1]} : vector<64x2xf32> to vector<64x1xf32>
    %9 = vector.extract_strided_slice %0 {offsets = [1, 0], sizes = [1, 128], strides = [1, 1]} : vector<2x128xf32> to vector<1x128xf32>
    %10 = vector.broadcast %8 : vector<64x1xf32> to vector<64x128xf32>
    %11 = vector.broadcast %9 : vector<1x128xf32> to vector<64x128xf32>
    %12 = arith.mulf %10, %11 : vector<64x128xf32>
    %13 = arith.addf %7, %12 : vector<64x128xf32>
    %14 = vector.extract_strided_slice %2 {offsets = [0, 0], sizes = [64, 1], strides = [1, 1]} : vector<64x3xf32> to vector<64x1xf32>
    %15 = vector.broadcast %14 : vector<64x1xf32> to vector<64x128xf32>
    %16 = arith.addf %13, %15 : vector<64x128xf32>
    %cst = arith.constant 0.000000e+00 : f32
    %17 = vector.broadcast %cst : f32 to vector<64x128xf32>
    %18 = arith.maximumf %16, %17 : vector<64x128xf32>
    %c0_5 = arith.constant 0 : index
    %c0_6 = arith.constant 0 : index
    %19 = vector.load %arg3[%c0_5, %c0_6] : memref<64x64xf32, #tpu.memory_space<vmem>>, vector<64x64xf32>
    %cst_7 = arith.constant dense<0.000000e+00> : vector<64x128xf32>
    %20 = tpu.matmul %19, %18, %cst_7 {dimension_numbers = #tpu.dot_dimension_numbers<[1], [0], [0], [1], [0, 0, 1, 1], [], []>} : vector<64x64xf32>, vector<64x128xf32>, vector<64x128xf32> -> vector<64x128xf32>
    %21 = vector.extract_strided_slice %2 {offsets = [0, 1], sizes = [64, 1], strides = [1, 1]} : vector<64x3xf32> to vector<64x1xf32>
    %22 = vector.broadcast %21 : vector<64x1xf32> to vector<64x128xf32>
    %23 = arith.addf %20, %22 : vector<64x128xf32>
    %cst_8 = arith.constant 0.000000e+00 : f32
    %24 = vector.broadcast %cst_8 : f32 to vector<64x128xf32>
    %25 = arith.maximumf %23, %24 : vector<64x128xf32>
    %c0_9 = arith.constant 0 : index
    %c0_10 = arith.constant 0 : index
    %26 = vector.load %arg4[%c0_9, %c0_10] : memref<3x64xf32, #tpu.memory_space<vmem>>, vector<3x64xf32>
    %cst_11 = arith.constant dense<0.000000e+00> : vector<3x128xf32>
    %27 = tpu.matmul %26, %25, %cst_11 {dimension_numbers = #tpu.dot_dimension_numbers<[1], [0], [0], [1], [0, 0, 1, 1], [], []>} : vector<3x64xf32>, vector<64x128xf32>, vector<3x128xf32> -> vector<3x128xf32>
    %28 = vector.extract_strided_slice %2 {offsets = [0, 2], sizes = [3, 1], strides = [1, 1]} : vector<64x3xf32> to vector<3x1xf32>
    %29 = vector.broadcast %28 : vector<3x1xf32> to vector<3x128xf32>
    %30 = arith.addf %27, %29 : vector<3x128xf32>
    %31 = vector.extract_strided_slice %30 {offsets = [0, 0], sizes = [1, 128], strides = [1, 1]} : vector<3x128xf32> to vector<1x128xf32>
    %32 = arith.negf %31 : vector<1x128xf32>
    %33 = math.exp %32 : vector<1x128xf32>
    %cst_12 = arith.constant 1.000000e+00 : f32
    %34 = vector.broadcast %cst_12 : f32 to vector<1x128xf32>
    %35 = arith.addf %34, %33 : vector<1x128xf32>
    %36 = arith.divf %34, %35 : vector<1x128xf32>
    %c0_13 = arith.constant 0 : index
    %c0_14 = arith.constant 0 : index
    %37 = vector.load %arg6[%c0_13, %c0_14] : memref<3x128xf32, #tpu.memory_space<vmem>>, vector<1x128xf32>
    tpu.vector_store %arg6[%c0_13, %c0_14], %36 {strides = array<i32>} : memref<3x128xf32, #tpu.memory_space<vmem>>, vector<1x128xf32>,
    %38 = vector.extract_strided_slice %30 {offsets = [1, 0], sizes = [2, 128], strides = [1, 1]} : vector<3x128xf32> to vector<2x128xf32>
    %c1 = arith.constant 1 : index
    %c0_15 = arith.constant 0 : index
    %39 = vector.load %arg6[%c1, %c0_15] : memref<3x128xf32, #tpu.memory_space<vmem>>, vector<2x128xf32>
    tpu.vector_store %arg6[%c1, %c0_15], %38 {strides = array<i32>} : memref<3x128xf32, #tpu.memory_space<vmem>>, vector<2x128xf32>,
    return
  }
  func.func @transform_0(%arg0: i32) -> (i32, i32) {
    %c0_i32 = arith.constant 0 : i32
    %c0_i32_0 = arith.constant 0 : i32
    return %c0_i32, %arg0 : i32, i32
  }
  func.func @transform_1(%arg0: i32) -> (i32, i32) {
    %c0_i32 = arith.constant 0 : i32
    %c0_i32_0 = arith.constant 0 : i32
    %c0_i32_1 = arith.constant 0 : i32
    return %c0_i32, %c0_i32_0 : i32, i32
  }
  func.func @transform_2(%arg0: i32) -> (i32, i32) {
    %c0_i32 = arith.constant 0 : i32
    %c0_i32_0 = arith.constant 0 : i32
    %c0_i32_1 = arith.constant 0 : i32
    return %c0_i32, %c0_i32_0 : i32, i32
  }
  func.func @transform_3(%arg0: i32) -> (i32, i32) {
    %c0_i32 = arith.constant 0 : i32
    %c0_i32_0 = arith.constant 0 : i32
    %c0_i32_1 = arith.constant 0 : i32
    return %c0_i32, %c0_i32_0 : i32, i32
  }
  func.func @transform_4(%arg0: i32) -> (i32, i32) {
    %c0_i32 = arith.constant 0 : i32
    %c0_i32_0 = arith.constant 0 : i32
    %c0_i32_1 = arith.constant 0 : i32
    return %c0_i32, %c0_i32_0 : i32, i32
  }
  func.func @transform_5(%arg0: i32) -> (i32, i32) {
    %c0_i32 = arith.constant 0 : i32
    %c0_i32_0 = arith.constant 0 : i32
    return %c0_i32, %arg0 : i32, i32
  }
}

</mosaic_0001>

<bundles_post_ra>
// kernel: tiny_generative_model.1
= control target key start
LH: loop header
LB: loop body
LE: loop exit
PB: predicated region body
PF: predicated region fallthrough
CT: control target
= control target key end

     0   :  { %v405_v0 = vmov 0   ;;  %v406_v4 = vmov 1   ;;  %vm231_vm0 = vcmask 523264   ;;  %s536_s1 = inlined_call_operand.vmem [shape: f32[64,2], index: 1, kind: input, shape index: {}]   ;;  %s537_s4 = inlined_call_operand.vmem [shape: f32[64,3], index: 4, kind: input, shape index: {}]   ;;  %s538_s0 = inlined_call_operand.vmem [shape: f32[2,128], index: 0, kind: input, shape index: {}]   ;;  %s539_s2 = inlined_call_operand.vmem [shape: f32[64,64], index: 2, kind: input, shape index: {}]   ;;  %s540_s3 = inlined_call_operand.vmem [shape: f32[3,64], index: 3, kind: input, shape index: {}]   ;;  %s541_s5 = inlined_call_operand.vmem [shape: f32[3,128], index: 5, kind: output, shape index: {}]  }
   0x1   :  { %391 = vset.pattern.permute.xlu2 %v405_v0  ;;  %389 = vset.pattern.permute.xlu1 %v405_v0  ;;  %v28_v1 = vld [vmem:[%s536_s1 + $0x38] sm:$0xff]  ;;  %v27_v2 = vld [vmem:[%s536_s1 + $0x30] sm:$0xff]  ;;  %v26_v3 = vld [vmem:[%s536_s1 + $0x28] sm:$0xff] }
   0x2   :  { %387 = vset.pattern.permute.xlu0 %v405_v0  ;;  %69 = vperm.xlu1 %389, %v27_v2   ;;  %v25_v5 = vld [vmem:[%s536_s1 + $0x20] sm:$0xff]  ;;  %v36_v6 = vld [vmem:[%s537_s4 + $0x38] sm:$0xff]  ;;  %v35_v8 = vld [vmem:[%s537_s4 + $0x30] sm:$0xff] }
   0x3   :  { %74 = vperm.xlu0 %387, %v28_v1   ;;  %64 = vperm.xlu2 %391, %v26_v3   ;;  %v24_v7 = vld [vmem:[%s536_s1 + $0x18] sm:$0xff]  ;;  %v23_v9 = vld [vmem:[%s536_s1 + $0x10] sm:$0xff]  ;;  %v34_v10 = vld [vmem:[%s537_s4 + $0x28] sm:$0xff] }
   0x4   :  { %v22_v11 = vld [vmem:[%s536_s1 + $0x8] sm:$0xff]  ;;  %v33_v12 = vld [vmem:[%s537_s4 + $0x20] sm:$0xff]  ;;  %v32_v14 = vld [vmem:[%s537_s4 + $0x18] sm:$0xff] }
   0x5   :  { %v21_v13 = vld [vmem:[%s536_s1] sm:$0xff]  ;;  %v31_v15 = vld [vmem:[%s537_s4 + $0x10] sm:$0xff]  ;;  %v30_v17 = vld [vmem:[%s537_s4 + $0x8] sm:$0xff] }
   0x6   :  { %v483_v16 = vld [vmem:[%s537_s4] sm:$0xff] }
   0x7   :  { %v20_v25 = vld [vmem:[%s538_s0] sm:$0x3] }
   0x8   :  { %v118_v26 = vperm.slane %v20_v25, 1  ;;  %v77_v27 = vperm.slane %v20_v25, 0  ;;  %v194_v25 = vld [vmem:[%s539_s2 + $0x18] sm:$0xff] }
   0xa   :  { %390 = vset.pattern.permute.xlu1 %v406_v4 }
   0xb   :  { %388 = vset.pattern.permute.xlu0 %v406_v4  ;;  %392 = vset.pattern.permute.xlu2 %v406_v4 }
   0xc   :  { %115 = vperm.xlu0 %388, %v28_v1   ;;  %111 = vperm.xlu1 %390, %v27_v2  }
   0xd   :  { %107 = vperm.xlu2 %392, %v26_v3  }
  0x14   :  { %393 = vset.pattern.permute.xlu1 %v405_v0  ;;  %103 = vperm.xlu0 %388, %v25_v5  }
  0x15   :  { %394 = vset.pattern.permute.xlu2 %v405_v0  ;;  %172 = vperm.xlu1 %393, %v36_v6  }
  0x16   :  { %59 = vperm.xlu2 %394, %v25_v5  }
  0x1c   :  { %99 = vperm.xlu0 %388, %v24_v7  }
  0x1d   :  { %167 = vperm.xlu1 %393, %v35_v8  }
  0x1e   :  { %54 = vperm.xlu2 %394, %v24_v7  }
  0x24   :  { %95 = vperm.xlu0 %388, %v23_v9  }
  0x25   :  { %162 = vperm.xlu1 %393, %v34_v10  }
  0x26   :  { %49 = vperm.xlu2 %394, %v23_v9  }
  0x2c   :  { %91 = vperm.xlu0 %388, %v22_v11  }
  0x2d   :  { %157 = vperm.xlu1 %393, %v33_v12  }
  0x2e   :  { %44 = vperm.xlu2 %394, %v22_v11  }
  0x34   :  { %87 = vperm.xlu0 %388, %v21_v13  }
  0x35   :  { %152 = vperm.xlu1 %393, %v32_v14  }
  0x36   :  { %39 = vperm.xlu2 %394, %v21_v13  }
  0x3c   :  { %395 = vset.pattern.permute.xlu0 %v405_v0 }
  0x3d   :  { %147 = vperm.xlu1 %393, %v31_v15   ;;  %137 = vperm.xlu0 %395, %v483_v16  }
  0x3e   :  { %142 = vperm.xlu2 %394, %v30_v17  }
  0x45   :  { %396 = vset.pattern.permute.xlu1 %v406_v4  ;;  %398 = vset.pattern.permute.xlu0 %v406_v4 }
  0x46   :  { %228 = vperm.xlu1 %396, %v36_v6   ;;  %212 = vperm.xlu0 %398, %v32_v14  }
  0x47   :  { %397 = vset.pattern.permute.xlu2 %v406_v4 }
  0x48   :  { %224 = vperm.xlu2 %397, %v35_v8  }
  0x4e   :  { %220 = vperm.xlu1 %396, %v34_v10  }
  0x50   :  { %216 = vperm.xlu2 %397, %v33_v12  }
  0x56   :  { %208 = vperm.xlu1 %396, %v31_v15  }
  0x58   :  { %204 = vperm.xlu2 %397, %v30_v17  }
  0x5d   :  { %v65_v18 = vpop.permute.xlu2 %64 }
  0x5e   :  { %200 = vperm.xlu1 %396, %v483_v16   ;;  %v83_v43 = vmul.f32 %v77_v27, %v65_v18 }
  0x67   :  { %v108_v19 = vpop.permute.xlu2 %107 }
  0x68   :  { %v124_v44 = vmul.f32 %v118_v26, %v108_v19 }
  0x6a   :  { %v132_v47 = vadd.f32 %v124_v44, %v83_v43 }
  0x70   :  { %v60_v22 = vpop.permute.xlu2 %59 }
  0x71   :  { %v82_v50 = vmul.f32 %v77_v27, %v60_v22  ;;  %v193_v22 = vld [vmem:[%s539_s2 + $0x10] sm:$0xff] }
  0x74   :  { %v70_v20 = vpop.permute.xlu1 %69 }
  0x75   :  { %v75_v21 = vpop.permute.xlu0 %74  ;;  %v84_v37 = vmul.f32 %v77_v27, %v70_v20 }
  0x76   :  { %v85_v29 = vmul.f32 %v77_v27, %v75_v21 }
  0x78   :  { %v55_v30 = vpop.permute.xlu2 %54 }
  0x79   :  { %v81_v60 = vmul.f32 %v77_v27, %v55_v30 }
  0x7e   :  { %v116_v23 = vpop.permute.xlu0 %115  ;;  %v112_v24 = vpop.permute.xlu1 %111 }
  0x7f   :  { %v126_v28 = vmul.f32 %v118_v26, %v116_v23  ;;  %v125_v35 = vmul.f32 %v118_v26, %v112_v24  ;;  %v196_v23 = vld [vmem:[%s539_s2 + $0x28] sm:$0xff]  ;;  %v191_v24 = vld [vmem:[%s539_s2] sm:$0xff] }
  0x80   :  { %v50_v41 = vpop.permute.xlu2 %49 }
  0x81   :  { %v134_v32 = vadd.f32 %v126_v28, %v85_v29  ;;  %v133_v39 = vadd.f32 %v125_v35, %v84_v37  ;;  %v80_v6 = vmul.f32 %v77_v27, %v50_v41  ;;  %v195_v28 = vld [vmem:[%s539_s2 + $0x20] sm:$0xff]  ;;  %v198_v29 = vld [vmem:[%s539_s2 + $0x38] sm:$0xff] }
  0x86   :  { %v104_v31 = vpop.permute.xlu0 %103 }
  0x87   :  { %v173_v33 = vpop.permute.xlu1 %172  ;;  %v123_v51 = vmul.f32 %v118_v26, %v104_v31 }
  0x88   :  { %v182_v34 = vadd.f32 %v173_v33, %v134_v32  ;;  %v45_v52 = vpop.permute.xlu2 %44 }
  0x89   :  { %v131_v55 = vadd.f32 %v123_v51, %v82_v50  ;;  %v79_v3 = vmul.f32 %v77_v27, %v45_v52 }
  0x8a   :  { %v190_v36 = vmax.f32 %v182_v34, 0.0  ;;  %v407_v34 = vmov 2  }
  0x8b   :  { %399 = vset.pattern.permute.xlu2 %v407_v34  ;;  %400 = vset.pattern.permute.xlu0 %v407_v34 }
  0x8c   :  { %264 = vmatpush.msra.mxu0 %v190_v36  ;;  %368 = vmatpush.msra.mxu2 %v190_v36 }
  0x8d   :  { %369 = vmatpush.msra.mxu3 %v190_v36  ;;  %307 = vperm.xlu2 %399, %v483_v16  }
  0x8e   :  { %v100_v38 = vpop.permute.xlu0 %99 }
  0x8f   :  { %v168_v40 = vpop.permute.xlu1 %167  ;;  %v122_v58 = vmul.f32 %v118_v26, %v100_v38 }
  0x90   :  { %v181_v42 = vadd.f32 %v168_v40, %v133_v39  ;;  %v40_v61 = vpop.permute.xlu2 %39 }
  0x91   :  { %v130_v63 = vadd.f32 %v122_v58, %v81_v60  ;;  %v78_v9 = vmul.f32 %v77_v27, %v40_v61  ;;  %v192_v27 = vld [vmem:[%s539_s2 + $0x8] sm:$0xff] }
  0x92   :  { %v189_v45 = vmax.f32 %v181_v42, 0.0 }
  0x94   :  { %265 = vmatpush.msra.mxu0 %v189_v45  ;;  %370 = vmatpush.msra.mxu2 %v189_v45 }
  0x95   :  { %371 = vmatpush.msra.mxu3 %v189_v45 }
  0x96   :  { %v96_v46 = vpop.permute.xlu0 %95 }
  0x97   :  { %v163_v48 = vpop.permute.xlu1 %162  ;;  %v121_v4 = vmul.f32 %v118_v26, %v96_v46 }
  0x98   :  { %v180_v49 = vadd.f32 %v163_v48, %v132_v47  ;;  %v143_v10 = vpop.permute.xlu2 %142 }
  0x99   :  { %v129_v11 = vadd.f32 %v121_v4, %v80_v6 }
  0x9a   :  { %v188_v53 = vmax.f32 %v180_v49, 0.0 }
  0x9c   :  { %266 = vmatpush.msra.mxu0 %v188_v53  ;;  %372 = vmatpush.msra.mxu2 %v188_v53 }
  0x9d   :  { %373 = vmatpush.msra.mxu3 %v188_v53 }
  0x9e   :  { %v92_v54 = vpop.permute.xlu0 %91 }
  0x9f   :  { %v158_v56 = vpop.permute.xlu1 %157  ;;  %v120_v1 = vmul.f32 %v118_v26, %v92_v54 }
  0xa0   :  { %v179_v57 = vadd.f32 %v158_v56, %v131_v55 }
  0xa1   :  { %v128_v7 = vadd.f32 %v120_v1, %v79_v3 }
  0xa2   :  { %v187_v59 = vmax.f32 %v179_v57, 0.0  ;;  %v225_v33 = vpop.permute.xlu2 %224 }
  0xa3   :  { %v176_v17 = vadd.f32 %v143_v10, %v128_v7 }
  0xa4   :  { %267 = vmatpush.msra.mxu0 %v187_v59  ;;  %374 = vmatpush.msra.mxu2 %v187_v59 }
  0xa5   :  { %375 = vmatpush.msra.mxu3 %v187_v59  ;;  %v184_v20 = vmax.f32 %v176_v17, 0.0 }
  0xa6   :  { %v88_v62 = vpop.permute.xlu0 %87 }
  0xa7   :  { %v153_v0 = vpop.permute.xlu1 %152  ;;  %v119_v8 = vmul.f32 %v118_v26, %v88_v62  ;;  %v197_v26 = vld [vmem:[%s539_s2 + $0x30] sm:$0xff]  ;;  %v305_v62 = vld [vmem:[%s540_s3] sm:$0x7] }
  0xa8   :  { %v178_v2 = vadd.f32 %v153_v0, %v130_v63 }
  0xa9   :  { %v127_v15 = vadd.f32 %v119_v8, %v78_v9 }
  0xaa   :  { %v186_v5 = vmax.f32 %v178_v2, 0.0  ;;  %v217_v38 = vpop.permute.xlu2 %216 }
  0xac   :  { %268 = vmatpush.msra.mxu0 %v186_v5  ;;  %376 = vmatpush.msra.mxu2 %v186_v5 }
  0xad   :  { %377 = vmatpush.msra.mxu3 %v186_v5 }
  0xaf   :  { %v148_v12 = vpop.permute.xlu1 %147  ;;  %v138_v13 = vpop.permute.xlu0 %137 }
  0xb0   :  { %v177_v14 = vadd.f32 %v148_v12, %v129_v11  ;;  %v175_v19 = vadd.f32 %v138_v13, %v127_v15 }
  0xb2   :  { %v185_v18 = vmax.f32 %v177_v14, 0.0  ;;  %v183_v21 = vmax.f32 %v175_v19, 0.0  ;;  %v205_v52 = vpop.permute.xlu2 %204 }
  0xb4   :  { %269 = vmatpush.msra.mxu0 %v185_v18  ;;  %378 = vmatpush.msra.mxu2 %v185_v18 }
  0xb5   :  { %379 = vmatpush.msra.mxu3 %v185_v18 }
  0xb6   :  { %270 = vmatpush.msra.mxu0 %v184_v20  ;;  %380 = vmatpush.msra.mxu2 %v184_v20 }
  0xb7   :  { %381 = vmatpush.msra.mxu3 %v184_v20 }
  0xb8   :  { %271 = vmatpush.msra.mxu0 %v183_v21  ;;  %382 = vmatpush.msra.mxu2 %v183_v21  ;;  %v229_v30 = vpop.permute.xlu1 %228  ;;  %v213_v47 = vpop.permute.xlu0 %212 }
  0xb9   :  { %383 = vmatpush.msra.mxu3 %v183_v21  ;;  %360 = vmatmul.msk.f32.vlgmr.msra.gmra.mxu2 %vm231_vm0, %v193_v22 }
  0xba   :  { %363 = vmatmul.msk.f32.vlgmr.msra.gmra.mxu3 %vm231_vm0, %v196_v23  ;;  %358 = vmatmul.msk.f32.vlgmr.msra.gmra.mxu0 %vm231_vm0, %v191_v24 }
  0xc0   :  { %v221_v35 = vpop.permute.xlu1 %220 }
  0xc1   :  { %361 = vmatmul.msk.f32.gmra.mxu2 %vm231_vm0, %v194_v25 }
  0xc2   :  { %364 = vmatmul.msk.f32.gmra.mxu3 %vm231_vm0, %v197_v26  ;;  %359 = vmatmul.msk.f32.gmra.mxu0 %vm231_vm0, %v192_v27 }
  0xc8   :  { %v209_v40 = vpop.permute.xlu1 %208 }
  0xc9   :  { %362 = vmatmul.msk.f32.gmra.mxu2 %vm231_vm0, %v195_v28 }
  0xca   :  { %365 = vmatmul.msk.f32.gmra.mxu3 %vm231_vm0, %v198_v29 }
  0xd0   :  { %v201_v55 = vpop.permute.xlu1 %200 }
  0xe7   :  { %v308_v63 = vpop.permute.xlu2 %307 }
 0x137   :  { %v273_v39 = vpop.f32.mrf.mxu0 }
 0x138   :  { %v274_v59 = vadd.f32 %v273_v39, %v201_v55 }
 0x13a   :  { %v297_v61 = vmax.f32 %v274_v59, 0.0 }
 0x13c   :  { %v279_v31 = vpop.f32.mrf.mxu2 }
 0x13d   :  { %v288_v32 = vpop.f32.mrf.mxu3  ;;  %v280_v53 = vadd.f32 %v279_v31, %v209_v40 }
 0x13e   :  { %v289_v45 = vadd.f32 %v288_v32, %v221_v35 }
 0x13f   :  { %v276_v16 = vpop.f32.mrf.mxu0  ;;  %v299_v58 = vmax.f32 %v280_v53, 0.0 }
 0x140   :  { %v302_v50 = vmax.f32 %v289_v45, 0.0  ;;  %v277_v56 = vadd.f32 %v276_v16, %v205_v52 }
 0x142   :  { %v298_v60 = vmax.f32 %v277_v56, 0.0 }
 0x144   :  { %v282_v36 = vpop.f32.mrf.mxu2 }
 0x145   :  { %v291_v37 = vpop.f32.mrf.mxu3  ;;  %v283_v51 = vadd.f32 %v282_v36, %v213_v47 }
 0x146   :  { %v292_v42 = vadd.f32 %v291_v37, %v225_v33 }
 0x147   :  { %v300_v57 = vmax.f32 %v283_v51, 0.0 }
 0x148   :  { %v303_v48 = vmax.f32 %v292_v42, 0.0 }
 0x14c   :  { %v285_v44 = vpop.f32.mrf.mxu2 }
 0x14d   :  { %v294_v41 = vpop.f32.mrf.mxu3  ;;  %v286_v49 = vadd.f32 %v285_v44, %v217_v38 }
 0x14e   :  { %v295_v43 = vadd.f32 %v294_v41, %v229_v30 }
 0x14f   :  { %v301_v54 = vmax.f32 %v286_v49, 0.0 }
 0x150   :  { %v304_v46 = vmax.f32 %v295_v43, 0.0 }
 0x152   :  { %321 = vmatpush.msra.mxu1 %v304_v46 }
 0x154   :  { %322 = vmatpush.msra.mxu1 %v303_v48 }
 0x156   :  { %323 = vmatpush.msra.mxu1 %v302_v50 }
 0x158   :  { %324 = vmatpush.msra.mxu1 %v301_v54 }
 0x15a   :  { %325 = vmatpush.msra.mxu1 %v300_v57 }
 0x15c   :  { %326 = vmatpush.msra.mxu1 %v299_v58 }
 0x15e   :  { %327 = vmatpush.msra.mxu1 %v298_v60 }
 0x160   :  { %328 = vmatpush.msra.mxu1 %v297_v61 }
 0x161   :  { %366 = vmatmul.msk.f32.vlgmr.msra.gmra.mxu1 %vm231_vm0, %v305_v62 }
 0x1de   :  { %v330_v0 = vpop.f32.mrf.mxu1 }
 0x1df   :  { %v331_v1 = vadd.f32 %v330_v0, %v308_v63 }
 0x1e1   :  { %v367_v2 = vmul.f32 -1.442695, %v331_v1  ;;  %353 = vst [vmem:[%s541_s5] sm:$0x6] %v331_v1 }
 0x1e3   :  { %401 = vpow2.f32 %v367_v2 }
 0x1e9   :  { %v402_v3 = vpop.eup %401 }
 0x1ea   :  { %v336_v4 = vadd.f32 1.0, %v402_v3 }
 0x1ec   :  { %403 = vrcp.f32 %v336_v4  ;;  %v348_v8 = vand.u32 2147483648, %v336_v4  ;;  %v346_v10 = vand.u32 2147483647, %v336_v4  ;;  %vm342_vm2 = vweird.f32 %v336_v4 }
 0x1ee   :  { %v349_v12 = vor.u32 1.1754944e-38, %v348_v8  ;;  %vm347_vm4 = vcmp.eq.f32.partialorder %v346_v10, 8.507059e+37 }
 0x1f2   :  { %v404_v5 = vpop.eup %403 }
 0x1f3   :  { %v338_v6 = vmul.f32 %v404_v5, %v336_v4  ;;  %vm343_vm1 = vweird.f32 %v404_v5 }
 0x1f4   :  { %vm344_vm3 = vmor %vm342_vm2, %vm343_vm1 }
 0x1f5   :  { %v339_v7 = vsub.f32 1.0, %v338_v6 }
 0x1f7   :  { %v340_v9 = vmul.f32 %v404_v5, %v339_v7 }
 0x1f9   :  { %v341_v11 = vadd.f32 %v404_v5, %v340_v9 }
 0x1fb   :  { %v345_v13 = vsel %vm344_vm3, %v404_v5, %v341_v11 }
 0x1fc   :  { %v350_v14 = vsel %vm347_vm4, %v349_v12, %v345_v13 }
 0x1fd   :  { %352 = vst [vmem:[%s541_s5] sm:$0x1] %v350_v14 }

</bundles_post_ra>
